<compile_context>
chip_gen: v7x
topology: tpu7x:2x2x1
jax: 0.10.0
libtpu: 0.0.40
codegen_flags: <defaults>
</compile_context>

<pallas_src>
import jax
import jax.numpy as jnp
from jax.experimental import pallas as pl
from jax.experimental.pallas import tpu as pltpu

BN_EPS = 1e-5
_VMEM_LIMIT = 32 * 1024 * 1024  # explicit scoped-VMEM limit, safe on v5e/v6e/v7x


def conv_stats_kernel(p_ref, w_ref, conv_ref, stats_ref):
    """One M-tile: conv-as-matmul on the MXU (f32 acc) + per-tile sum / sum-of-sq."""
    acc = jnp.dot(p_ref[...], w_ref[...], preferred_element_type=jnp.float32)
    conv_ref[...] = acc
    s = jnp.sum(acc, axis=0, keepdims=True)          # (1, Cp)
    sq = jnp.sum(acc * acc, axis=0, keepdims=True)   # (1, Cp)  (E[x^2] path)
    pad = jnp.zeros((6, acc.shape[1]), jnp.float32)
    stats_ref[...] = jnp.concatenate([s, sq, pad], axis=0)   # (8, Cp) partials


def bn_relu_kernel(conv_ref, scale_ref, shift_ref, o_ref):
    """One M-tile: y = conv * scale + shift, then ReLU (all f32)."""
    o_ref[...] = jnp.maximum(conv_ref[...] * scale_ref[...] + shift_ref[...], 0.0)


def _matmul_dtype(m_rows):
    # bf16 MXU operands halve the dominant HBM patch stream.  bf16 packs 16 rows
    # per vreg, so only use it when the row count is 16-aligned.
    return jnp.bfloat16 if m_rows % 16 == 0 else jnp.float32


def _choose_tile_m(m_rows, target, step):
    t = min(target, m_rows)
    t -= t % step
    for cand in range(t, step - 1, -step):
        if m_rows % cand == 0:
            return cand
    return m_rows


def common_conv_forward(x_nchw, weight, bias, gamma, beta, kernel_size=3,
                        tile_m_target=512):
    """Forward of CommonConv(in_nc, out_nc, 3, pad_type='same',
    norm_type='batchnorm', act_type='relu', mode='CNA').

    `bias` is accepted for API fidelity but not applied: a per-channel bias added
    before training-mode BatchNorm cancels exactly in (x - mean) and leaves the
    variance unchanged, so dropping it is numerically exact.
    """
    del bias  # exact cancellation under BN (see docstring)

    N, Cin, H, W = x_nchw.shape
    Cout = weight.shape[0]
    K = kernel_size
    pad = (K - 1) // 2            # 'same' padding, stride=1, dilation=1
    M = N * H * W
    assert M % 8 == 0, "N*H*W must be a multiple of 8 (sublane alignment)"

    compute_dtype = _matmul_dtype(M)
    step = 16 if compute_dtype == jnp.bfloat16 else 8
    tile_m = _choose_tile_m(M, tile_m_target, step)
    num_tiles = M // tile_m

    Kdim = K * K * Cin
    Kp = pl.cdiv(Kdim, 128) * 128
    Cp = pl.cdiv(Cout, 128) * 128
    itm = 2 if compute_dtype == jnp.bfloat16 else 4

    # --- wrapper-side im2col: NCHW -> NHWC -> zero-pad -> (M, Kdim) patches ---
    x_nhwc = jnp.transpose(x_nchw, (0, 2, 3, 1)).astype(compute_dtype)
    xp = jnp.pad(x_nhwc, ((0, 0), (pad, pad), (pad, pad), (0, 0)))
    slabs = [xp[:, dy:dy + H, dx:dx + W, :] for dy in range(K) for dx in range(K)]
    patches = jnp.concatenate(slabs, axis=-1).reshape(M, Kdim)
    p_pad = jnp.pad(patches, ((0, 0), (0, Kp - Kdim)))

    # PyTorch weight (Cout, Cin, K, K) -> (Kdim, Cout) with (ky, kx, c) row order.
    w_mat = jnp.transpose(weight, (2, 3, 1, 0)).reshape(Kdim, Cout)
    w_pad = jnp.pad(w_mat.astype(compute_dtype), ((0, Kp - Kdim), (0, Cp - Cout)))

    # ---------------- pass 1: gridded matmul + per-tile BN partials ----------------
    cost1 = pl.CostEstimate(
        flops=2 * M * Kp * Cp,
        transcendentals=0,
        bytes_accessed=M * Kp * itm + Kp * Cp * itm + M * Cp * 4
        + num_tiles * 8 * Cp * 4)

    conv_out, partial = pl.pallas_call(
        conv_stats_kernel,
        out_shape=(jax.ShapeDtypeStruct((M, Cp), jnp.float32),
                   jax.ShapeDtypeStruct((num_tiles * 8, Cp), jnp.float32)),
        grid_spec=pltpu.PrefetchScalarGridSpec(
            num_scalar_prefetch=0,
            grid=(num_tiles,),
            in_specs=[
                pl.BlockSpec((tile_m, Kp), lambda i: (i, 0)),   # patch stream
                pl.BlockSpec((Kp, Cp), lambda i: (0, 0)),       # weight, resident
            ],
            out_specs=(
                pl.BlockSpec((tile_m, Cp), lambda i: (i, 0)),   # conv output tile
                pl.BlockSpec((8, Cp), lambda i: (i, 0)),        # per-tile stats
            )),
        compiler_params=pltpu.CompilerParams(
            dimension_semantics=("parallel",),
            vmem_limit_bytes=_VMEM_LIMIT),
        cost_estimate=cost1,
    )(p_pad, w_pad)

    # ---- finalize BN statistics (tiny XLA work on (num_tiles, 8, Cp) partials) ----
    part = partial.reshape(num_tiles, 8, Cp)
    mean = part[:, 0, :].sum(axis=0) / M
    var = jnp.maximum(part[:, 1, :].sum(axis=0) / M - mean * mean, 0.0)  # biased
    rstd = jax.lax.rsqrt(var + BN_EPS)
    g_pad = jnp.pad(gamma.astype(jnp.float32), (0, Cp - Cout))
    b_pad = jnp.pad(beta.astype(jnp.float32), (0, Cp - Cout))
    scale = (g_pad * rstd)[None, :]                      # (1, Cp)
    shift = (b_pad - mean * g_pad * rstd)[None, :]       # (1, Cp)

    # ---------------- pass 2: gridded BN-apply + ReLU ----------------
    cost2 = pl.CostEstimate(flops=3 * M * Cp, transcendentals=0,
                            bytes_accessed=2 * M * Cp * 4 + 2 * Cp * 4)

    out = pl.pallas_call(
        bn_relu_kernel,
        out_shape=jax.ShapeDtypeStruct((M, Cp), jnp.float32),
        grid_spec=pltpu.PrefetchScalarGridSpec(
            num_scalar_prefetch=0,
            grid=(num_tiles,),
            in_specs=[
                pl.BlockSpec((tile_m, Cp), lambda i: (i, 0)),
                pl.BlockSpec((1, Cp), lambda i: (0, 0)),
                pl.BlockSpec((1, Cp), lambda i: (0, 0)),
            ],
            out_specs=pl.BlockSpec((tile_m, Cp), lambda i: (i, 0))),
        compiler_params=pltpu.CompilerParams(
            dimension_semantics=("parallel",),
            vmem_limit_bytes=_VMEM_LIMIT),
        cost_estimate=cost2,
    )(conv_out, scale, shift)

    y = out[:, :Cout].reshape(N, H, W, Cout)
    return jnp.transpose(y, (0, 3, 1, 2))  # back to NCHW


def _reference(x, weight, bias, gamma, beta, conv_dtype=jnp.float32):
    """Pure-JAX reference: conv(+bias) -> BN(batch stats, biased var) -> ReLU."""
    K = weight.shape[-1]
    p = (K - 1) // 2
    y = jax.lax.conv_general_dilated(
        x.astype(conv_dtype), weight.astype(conv_dtype),
        window_strides=(1, 1), padding=((p, p), (p, p)),
        dimension_numbers=("NCHW", "OIHW", "NCHW"),
        preferred_element_type=jnp.float32)
    y = y + bias[None, :, None, None]
    mean = y.mean(axis=(0, 2, 3), keepdims=True)
    var = ((y - mean) ** 2).mean(axis=(0, 2, 3), keepdims=True)
    yn = (y - mean) * jax.lax.rsqrt(var + BN_EPS)
    yn = yn * gamma[None, :, None, None] + beta[None, :, None, None]
    return jnp.maximum(yn, 0.0)


if __name__ == "__main__":
    # CommonConv(in_nc=4, out_nc=8, kernel_size=3, stride=1, dilation=1,
    #            groups=1, bias=True, pad_type='same',
    #            norm_type='batchnorm', act_type='relu', mode='CNA')
    N, Cin, H, W, Cout, K = 2, 4, 16, 16, 8, 3

    key = jax.random.PRNGKey(0)
    kx, kw, kb = jax.random.split(key, 3)
    x = jax.random.normal(kx, (N, Cin, H, W), jnp.float32)
    weight = jax.random.normal(kw, (Cout, Cin, K, K), jnp.float32) * 0.1
    bias = jax.random.normal(kb, (Cout,), jnp.float32) * 0.05
    gamma = jnp.ones((Cout,), jnp.float32)   # BatchNorm2d affine init
    beta = jnp.zeros((Cout,), jnp.float32)

    fwd = jax.jit(common_conv_forward,
                  static_argnames=("kernel_size", "tile_m_target"))
    # tile_m_target=128 -> 4 grid steps at this toy size (exercises the pipelined
    # grid + partial-stats reduction); production sizes should keep the >=512 default.
    out = jax.block_until_ready(
        fwd(x, weight, bias, gamma, beta, kernel_size=K, tile_m_target=128))
    assert out.shape == (N, Cout, H, W)

    # Matched-precision reference (conv operands cast to the same MXU dtype).
    mm_dtype = _matmul_dtype(N * H * W)
    ref_mm = jax.block_until_ready(
        _reference(x, weight, bias, gamma, beta, conv_dtype=mm_dtype))
    assert jnp.allclose(out, ref_mm, atol=5e-3, rtol=5e-3), \
        "mismatch vs matched-precision reference"

    # Full-f32 reference (module semantics); looser tolerance covers bf16 MXU inputs.
    ref_f32 = jax.block_until_ready(
        _reference(x, weight, bias, gamma, beta, conv_dtype=jnp.float32))
    assert jnp.allclose(out, ref_f32, atol=3e-2, rtol=3e-2), \
        "mismatch vs f32 reference"

    print("KERNEL_OK")
</pallas_src>

<mosaic_0001>
module attributes {stable_mosaic.version = 11 : i64} {
  func.func @conv_stats_kernel(%arg0: i32, %arg1: memref<128x128xbf16, #tpu.memory_space<vmem>>, %arg2: memref<128x128xbf16, #tpu.memory_space<vmem>>, %arg3: memref<128x128xf32, #tpu.memory_space<vmem>>, %arg4: memref<8x128xf32, #tpu.memory_space<vmem>>) attributes {dimension_semantics = [#tpu.dimension_semantics<parallel>], iteration_bounds = array<i64: 4>, scalar_prefetch = 0 : i64, scratch_operands = 0 : i64, tpu.core_type = #tpu.core_type<tc>, window_params = [{transform_indices = @transform_0, window_bounds = array<i64: 128, 128>}, {pipeline_mode = #tpu.pipeline_mode<synchronous>, transform_indices = @transform_1, window_bounds = array<i64: 128, 128>}, {transform_indices = @transform_2, window_bounds = array<i64: 128, 128>}, {transform_indices = @transform_3, window_bounds = array<i64: 8, 128>}]} {
    %c0 = arith.constant 0 : index
    %c0_0 = arith.constant 0 : index
    %0 = vector.load %arg1[%c0, %c0_0] : memref<128x128xbf16, #tpu.memory_space<vmem>>, vector<128x128xbf16>
    %c0_1 = arith.constant 0 : index
    %c0_2 = arith.constant 0 : index
    %1 = vector.load %arg2[%c0_1, %c0_2] : memref<128x128xbf16, #tpu.memory_space<vmem>>, vector<128x128xbf16>
    %cst = arith.constant dense<0.000000e+00> : vector<128x128xf32>
    %2 = tpu.matmul %0, %1, %cst {dimension_numbers = #tpu.dot_dimension_numbers<[1], [0], [0], [1], [0, 0, 1, 1], [], []>} : vector<128x128xbf16>, vector<128x128xbf16>, vector<128x128xf32> -> vector<128x128xf32>
    %c0_3 = arith.constant 0 : index
    %c0_4 = arith.constant 0 : index
    %3 = vector.load %arg3[%c0_3, %c0_4] : memref<128x128xf32, #tpu.memory_space<vmem>>, vector<128x128xf32>
    tpu.vector_store %arg3[%c0_3, %c0_4], %2 {strides = array<i32>} : memref<128x128xf32, #tpu.memory_space<vmem>>, vector<128x128xf32>,
    %cst_5 = arith.constant dense<0.000000e+00> : vector<128xf32>
    %4 = vector.multi_reduction <add>, %2, %cst_5 [0] : vector<128x128xf32> to vector<128xf32>
    %5 = vector.shape_cast %4 : vector<128xf32> to vector<1x128xf32>
    %6 = arith.mulf %2, %2 : vector<128x128xf32>
    %cst_6 = arith.constant dense<0.000000e+00> : vector<128xf32>
    %7 = vector.multi_reduction <add>, %6, %cst_6 [0] : vector<128x128xf32> to vector<128xf32>
    %8 = vector.shape_cast %7 : vector<128xf32> to vector<1x128xf32>
    %cst_7 = arith.constant 0.000000e+00 : f32
    %9 = vector.broadcast %cst_7 : f32 to vector<6x128xf32>
    %10 = tpu.concatenate %5, %8, %9 in 0 : vector<1x128xf32>, vector<1x128xf32>, vector<6x128xf32> -> vector<8x128xf32>
    %c0_8 = arith.constant 0 : index
    %c0_9 = arith.constant 0 : index
    %11 = vector.load %arg4[%c0_8, %c0_9] : memref<8x128xf32, #tpu.memory_space<vmem>>, vector<8x128xf32>
    tpu.vector_store %arg4[%c0_8, %c0_9], %10 {strides = array<i32>} : memref<8x128xf32, #tpu.memory_space<vmem>>, vector<8x128xf32>,
    return
  }
  func.func @transform_0(%arg0: i32) -> (i32, i32) {
    %c0_i32 = arith.constant 0 : i32
    %c0_i32_0 = arith.constant 0 : i32
    return %arg0, %c0_i32 : i32, i32
  }
  func.func @transform_1(%arg0: i32) -> (i32, i32) {
    %c0_i32 = arith.constant 0 : i32
    %c0_i32_0 = arith.constant 0 : i32
    %c0_i32_1 = arith.constant 0 : i32
    return %c0_i32, %c0_i32_0 : i32, i32
  }
  func.func @transform_2(%arg0: i32) -> (i32, i32) {
    %c0_i32 = arith.constant 0 : i32
    %c0_i32_0 = arith.constant 0 : i32
    return %arg0, %c0_i32 : i32, i32
  }
  func.func @transform_3(%arg0: i32) -> (i32, i32) {
    %c0_i32 = arith.constant 0 : i32
    %c0_i32_0 = arith.constant 0 : i32
    return %arg0, %c0_i32 : i32, i32
  }
}

module attributes {stable_mosaic.version = 11 : i64} {
  func.func @bn_relu_kernel(%arg0: i32, %arg1: memref<128x128xf32, #tpu.memory_space<vmem>>, %arg2: memref<1x128xf32, #tpu.memory_space<vmem>>, %arg3: memref<1x128xf32, #tpu.memory_space<vmem>>, %arg4: memref<128x128xf32, #tpu.memory_space<vmem>>) attributes {dimension_semantics = [#tpu.dimension_semantics<parallel>], iteration_bounds = array<i64: 4>, scalar_prefetch = 0 : i64, scratch_operands = 0 : i64, tpu.core_type = #tpu.core_type<tc>, window_params = [{transform_indices = @transform_0, window_bounds = array<i64: 128, 128>}, {pipeline_mode = #tpu.pipeline_mode<synchronous>, transform_indices = @transform_1, window_bounds = array<i64: 1, 128>}, {pipeline_mode = #tpu.pipeline_mode<synchronous>, transform_indices = @transform_2, window_bounds = array<i64: 1, 128>}, {transform_indices = @transform_3, window_bounds = array<i64: 128, 128>}]} {
    %c0 = arith.constant 0 : index
    %c0_0 = arith.constant 0 : index
    %0 = vector.load %arg1[%c0, %c0_0] : memref<128x128xf32, #tpu.memory_space<vmem>>, vector<128x128xf32>
    %c0_1 = arith.constant 0 : index
    %c0_2 = arith.constant 0 : index
    %1 = vector.load %arg2[%c0_1, %c0_2] : memref<1x128xf32, #tpu.memory_space<vmem>>, vector<1x128xf32>
    %2 = vector.broadcast %1 : vector<1x128xf32> to vector<128x128xf32>
    %3 = arith.mulf %0, %2 : vector<128x128xf32>
    %c0_3 = arith.constant 0 : index
    %c0_4 = arith.constant 0 : index
    %4 = vector.load %arg3[%c0_3, %c0_4] : memref<1x128xf32, #tpu.memory_space<vmem>>, vector<1x128xf32>
    %5 = vector.broadcast %4 : vector<1x128xf32> to vector<128x128xf32>
    %6 = arith.addf %3, %5 : vector<128x128xf32>
    %cst = arith.constant 0.000000e+00 : f32
    %7 = vector.broadcast %cst : f32 to vector<128x128xf32>
    %8 = arith.maximumf %6, %7 : vector<128x128xf32>
    %c0_5 = arith.constant 0 : index
    %c0_6 = arith.constant 0 : index
    %9 = vector.load %arg4[%c0_5, %c0_6] : memref<128x128xf32, #tpu.memory_space<vmem>>, vector<128x128xf32>
    tpu.vector_store %arg4[%c0_5, %c0_6], %8 {strides = array<i32>} : memref<128x128xf32, #tpu.memory_space<vmem>>, vector<128x128xf32>,
    return
  }
  func.func @transform_0(%arg0: i32) -> (i32, i32) {
    %c0_i32 = arith.constant 0 : i32
    %c0_i32_0 = arith.constant 0 : i32
    return %arg0, %c0_i32 : i32, i32
  }
  func.func @transform_1(%arg0: i32) -> (i32, i32) {
    %c0_i32 = arith.constant 0 : i32
    %c0_i32_0 = arith.constant 0 : i32
    %c0_i32_1 = arith.constant 0 : i32
    return %c0_i32, %c0_i32_0 : i32, i32
  }
  func.func @transform_2(%arg0: i32) -> (i32, i32) {
    %c0_i32 = arith.constant 0 : i32
    %c0_i32_0 = arith.constant 0 : i32
    %c0_i32_1 = arith.constant 0 : i32
    return %c0_i32, %c0_i32_0 : i32, i32
  }
  func.func @transform_3(%arg0: i32) -> (i32, i32) {
    %c0_i32 = arith.constant 0 : i32
    %c0_i32_0 = arith.constant 0 : i32
    return %arg0, %c0_i32 : i32, i32
  }
}

</mosaic_0001>

<bundles_post_ra>
// kernel: common_conv_forward.2
= control target key start
LH: loop header
LB: loop body
LE: loop exit
PB: predicated region body
PF: predicated region fallthrough
CT: control target
= control target key end

     0   :  { %s721_s12 = smov 0   ;;  %s802_s0 = inlined_call_operand.vmem [shape: bf16[512,128], index: 0, kind: input, shape index: {}]   ;;  %s803_s1 = inlined_call_operand.vmem [shape: bf16[128,128], index: 1, kind: input, shape index: {}]   ;;  %s804_s2 = inlined_call_operand.vmem [shape: f32[512,128], index: 2, kind: output, shape index: {0}]   ;;  %s805_s3 = inlined_call_operand.vmem [shape: f32[32,128], index: 3, kind: output, shape index: {1}]  }
   0x1 LB: > { %s727_s13 = sadd.s32 4294967295, %s699_s12   ;;  %p581_p0 = scmp.ge.s32.totalorder %s699_s12, 1  ;;  %s699_s12 = sphi %s721_s12, %s14_s12  }
   0x2   : > { %p141_p1 = scmp.lt.s32.totalorder %s699_s12, 5 }
   0x4   : > { %p142_p2 = pnand %p581_p0, %p141_p1 }
   0x5   : > { %v677_v0 = vld [vmem:[%s803_s1] sm:$0xff] (!%p142_p2)   ;;  %s582_s16 = sshll.u32 (!%p142_p2), %s727_s13, 4  ;;  %v678_v1 = vld [vmem:[%s803_s1 + $0x8] sm:$0xff] (!%p142_p2)   ;;  %v679_v2 = vld [vmem:[%s803_s1 + $0x10] sm:$0xff] (!%p142_p2)   ;;  %p181_p4 = scmp.lt.s32.totalorder (!%p142_p2), %s727_s13, 3  ;;  %vm485_vm0 = vcmask (!%p142_p2), 1040384  }
   0x6   : > { %145 = sbr.rel (%p142_p2) target bundleno = 300 (0x12c), region = 28  ;;  %p170_p3 = scmp.lt.s32.totalorder (!%p142_p2), %s582_s16, 63  ;;  %621 = vmatprep.subr.bf16.mxu0 (!%p142_p2), %v677_v0  ;;  %653 = vmatprep.subr.bf16.mxu1 (!%p142_p2), %v677_v0  ;;  %v680_v3 = vld [vmem:[%s803_s1 + $0x18] sm:$0xff] (!%p142_p2)   ;;  %v681_v5 = vld [vmem:[%s803_s1 + $0x20] sm:$0xff] (!%p142_p2)   ;;  %v682_v7 = vld [vmem:[%s803_s1 + $0x28] sm:$0xff] (!%p142_p2)   ;;  %vm487_vm1 = vcmask (!%p142_p2), 1041408  }
   0x7   : > { %622 = vmatpush3.bf16.msra.mxu0 (!%p142_p2), %v677_v0  ;;  %661 = vmatpush3.bf16.msra.mxu1 (!%p142_p2), %v677_v0  ;;  %v683_v8 = vld [vmem:[%s803_s1 + $0x30] sm:$0xff] (!%p142_p2)   ;;  %v684_v9 = vld [vmem:[%s803_s1 + $0x38] sm:$0xff] (!%p142_p2)  }
   0x8   : > { %623 = vmatprep.subr.bf16.mxu0 (!%p142_p2), %v678_v1  ;;  %654 = vmatprep.subr.bf16.mxu1 (!%p142_p2), %v678_v1 }
   0xb   : > { %624 = vmatpush3.bf16.msra.mxu0 (!%p142_p2), %v678_v1  ;;  %662 = vmatpush3.bf16.msra.mxu1 (!%p142_p2), %v678_v1 }
   0xc   : > { %625 = vmatprep.subr.bf16.mxu0 (!%p142_p2), %v679_v2  ;;  %655 = vmatprep.subr.bf16.mxu1 (!%p142_p2), %v679_v2 }
   0xd   : > { %s807_s16 = smov (!%p170_p3, %s582_s16), 63  ;;  %s809_s13 = smov (!%p181_p4, %s727_s13), 3 }
   0xe   : > { %s583_s21 = sshll.u32 %s807_s16, 2  ;;  %s585_s8 = sshll.u32 %s807_s16, 3 }
   0xf   : > { %s747_s24 = scalar_lea.vmem %s802_s0, %s583_s21  ;;  %626 = vmatpush3.bf16.msra.mxu0 %v679_v2  ;;  %663 = vmatpush3.bf16.msra.mxu1 %v679_v2  ;;  %s776_s11 = scalar_lea.vmem %s804_s2, %s585_s8 }
  0x10   : > { %v685_v4 = vld [vmem:[%s747_s24] sm:$0xff]   ;;  %627 = vmatprep.subr.bf16.mxu0 %v680_v3  ;;  %656 = vmatprep.subr.bf16.mxu1 %v680_v3  ;;  %v686_v10 = vld [vmem:[%s747_s24 + $0x8] sm:$0xff]   ;;  %v687_v12 = vld [vmem:[%s747_s24 + $0x10] sm:$0xff]   ;;  %s586_s14 = sshll.u32 %s809_s13, 3 }
  0x11   : > { %637 = vmatprep.mubr.bf16.mxu0 %v685_v4  ;;  %v689_v6 = vld [vmem:[%s747_s24 + $0x20] sm:$0xff]   ;;  %v690_v11 = vld [vmem:[%s747_s24 + $0x28] sm:$0xff]   ;;  %v691_v13 = vld [vmem:[%s747_s24 + $0x30] sm:$0xff]   ;;  %s184_s17 = scalar_lea.vmem %s805_s3, %s586_s14 }
  0x12   : > { %645 = vmatprep.mubr.bf16.mxu1 %v689_v6  ;;  %v688_v14 = vld [vmem:[%s747_s24 + $0x18] sm:$0xff]  }
  0x13   : > { %628 = vmatpush3.bf16.msra.mxu0 %v680_v3  ;;  %664 = vmatpush3.bf16.msra.mxu1 %v680_v3  ;;  %v692_v15 = vld [vmem:[%s747_s24 + $0x38] sm:$0xff]  }
  0x14   : > { %629 = vmatprep.subr.bf16.mxu0 %v681_v5  ;;  %657 = vmatprep.subr.bf16.mxu1 %v681_v5 }
  0x17   : > { %630 = vmatpush3.bf16.msra.mxu0 %v681_v5  ;;  %665 = vmatpush3.bf16.msra.mxu1 %v681_v5 }
  0x18   : > { %631 = vmatprep.subr.bf16.mxu0 %v682_v7  ;;  %658 = vmatprep.subr.bf16.mxu1 %v682_v7 }
  0x1b   : > { %632 = vmatpush3.bf16.msra.mxu0 %v682_v7  ;;  %666 = vmatpush3.bf16.msra.mxu1 %v682_v7 }
  0x1c   : > { %633 = vmatprep.subr.bf16.mxu0 %v683_v8  ;;  %659 = vmatprep.subr.bf16.mxu1 %v683_v8 }
  0x1f   : > { %634 = vmatpush3.bf16.msra.mxu0 %v683_v8  ;;  %667 = vmatpush3.bf16.msra.mxu1 %v683_v8 }
  0x20   : > { %635 = vmatprep.subr.bf16.mxu0 %v684_v9  ;;  %660 = vmatprep.subr.bf16.mxu1 %v684_v9 }
  0x23   : > { %636 = vmatpush3.bf16.msra.mxu0 %v684_v9  ;;  %668 = vmatpush3.bf16.msra.mxu1 %v684_v9 }
  0x26   : > { %638 = vmatmul.mubr.bf16.vlgmr.msra.gmra.mrb[0].mxu0 %v686_v10  ;;  %646 = vmatmul.mubr.bf16.vlgmr.msra.gmra.mrb[0].mxu1 %v690_v11 }
  0x27   : > { %641 = vmatprep.mubr.bf16.mxu0 %v687_v12  ;;  %649 = vmatprep.mubr.bf16.mxu1 %v691_v13 }
  0x2e   : > { %642 = vmatmul.mubr.bf16.gmra.mrb[4].mxu0 %v688_v14  ;;  %650 = vmatmul.mubr.bf16.gmra.mrb[4].mxu1 %v692_v15 }
  0xf9   : > { %v639_v16 = vpop.f32.mrb[0].mxu0  ;;  %v647_v17 = vpop.f32.mrb[0].mxu1 }
  0xfa   : > { %413 = vst [vmem:[%s776_s11 + $0x10] sm:$0xff] %v639_v16  ;;  %v348_v18 = vpop.f32.mrb[1].mxu0  ;;  %421 = vst [vmem:[%s776_s11 + $0x50] sm:$0xff] %v647_v17  ;;  %v380_v19 = vpop.f32.mrb[1].mxu1  ;;  %v450_v27 = vmul.f32 %v639_v16, %v639_v16  ;;  %v458_v59 = vmul.f32 %v647_v17, %v647_v17 }
  0xfb   : > { %411 = vst [vmem:[%s776_s11] sm:$0xff] %v348_v18  ;;  %v640_v20 = vpop.f32.mrb[2].mxu0  ;;  %419 = vst [vmem:[%s776_s11 + $0x40] sm:$0xff] %v380_v19  ;;  %v648_v21 = vpop.f32.mrb[2].mxu1  ;;  %v448_v24 = vmul.f32 %v348_v18, %v348_v18  ;;  %v456_v53 = vmul.f32 %v380_v19, %v380_v19 }
  0xfc   : > { %414 = vst [vmem:[%s776_s11 + $0x18] sm:$0xff] %v640_v20  ;;  %v351_v22 = vpop.f32.mrb[3].mxu0  ;;  %422 = vst [vmem:[%s776_s11 + $0x58] sm:$0xff] %v648_v21  ;;  %v383_v23 = vpop.f32.mrb[3].mxu1  ;;  %v451_v30 = vmul.f32 %v640_v20, %v640_v20  ;;  %v459_v62 = vmul.f32 %v648_v21, %v648_v21 }
  0xfd   : > { %412 = vst [vmem:[%s776_s11 + $0x8] sm:$0xff] %v351_v22  ;;  %v427_v25 = vadd.f32 %v351_v22, %v348_v18  ;;  %v449_v26 = vmul.f32 %v351_v22, %v351_v22  ;;  %420 = vst [vmem:[%s776_s11 + $0x48] sm:$0xff] %v383_v23  ;;  %v457_v58 = vmul.f32 %v383_v23, %v383_v23 }
  0xff   : > { %v428_v28 = vadd.f32 %v639_v16, %v427_v25  ;;  %v464_v29 = vadd.f32 %v449_v26, %v448_v24 }
 0x101   : > { %v465_v31 = vadd.f32 %v464_v29, %v450_v27  ;;  %v643_v32 = vpop.f32.mrb[4].mxu0  ;;  %v429_v33 = vadd.f32 %v640_v20, %v428_v28  ;;  %v651_v34 = vpop.f32.mrb[4].mxu1 }
 0x102   : > { %417 = vst [vmem:[%s776_s11 + $0x30] sm:$0xff] %v643_v32  ;;  %v364_v35 = vpop.f32.mrb[5].mxu0  ;;  %425 = vst [vmem:[%s776_s11 + $0x70] sm:$0xff] %v651_v34  ;;  %v396_v36 = vpop.f32.mrb[5].mxu1  ;;  %v454_v47 = vmul.f32 %v643_v32, %v643_v32  ;;  %v462_v7 = vmul.f32 %v651_v34, %v651_v34 }
 0x103   : > { %415 = vst [vmem:[%s776_s11 + $0x20] sm:$0xff] %v364_v35  ;;  %v430_v37 = vadd.f32 %v429_v33, %v364_v35  ;;  %v452_v38 = vmul.f32 %v364_v35, %v364_v35  ;;  %v466_v39 = vadd.f32 %v465_v31, %v451_v30  ;;  %v644_v40 = vpop.f32.mrb[6].mxu0  ;;  %423 = vst [vmem:[%s776_s11 + $0x60] sm:$0xff] %v396_v36  ;;  %v652_v41 = vpop.f32.mrb[6].mxu1 }
 0x104   : > { %418 = vst [vmem:[%s776_s11 + $0x38] sm:$0xff] %v644_v40  ;;  %v367_v42 = vpop.f32.mrb[7].mxu0  ;;  %426 = vst [vmem:[%s776_s11 + $0x78] sm:$0xff] %v652_v41  ;;  %v399_v43 = vpop.f32.mrb[7].mxu1  ;;  %v455_v50 = vmul.f32 %v644_v40, %v644_v40  ;;  %v460_v1 = vmul.f32 %v396_v36, %v396_v36  ;;  %v463_v10 = vmul.f32 %v652_v41, %v652_v41 }
 0x105   : > { %v467_v44 = vadd.f32 %v466_v39, %v452_v38  ;;  %416 = vst [vmem:[%s776_s11 + $0x28] sm:$0xff] %v367_v42  ;;  %v431_v45 = vadd.f32 %v430_v37, %v367_v42  ;;  %v453_v46 = vmul.f32 %v367_v42, %v367_v42  ;;  %424 = vst [vmem:[%s776_s11 + $0x68] sm:$0xff] %v399_v43 }
 0x106   : > { %v461_v6 = vmul.f32 %v399_v43, %v399_v43 }
 0x107   : > { %v432_v48 = vadd.f32 %v643_v32, %v431_v45  ;;  %v468_v49 = vadd.f32 %v467_v44, %v453_v46 }
 0x109   : > { %v469_v51 = vadd.f32 %v468_v49, %v454_v47  ;;  %v433_v52 = vadd.f32 %v644_v40, %v432_v48 }
 0x10b   : > { %v434_v54 = vadd.f32 %v433_v52, %v380_v19  ;;  %v470_v55 = vadd.f32 %v469_v51, %v455_v50 }
 0x10d   : > { %v471_v56 = vadd.f32 %v470_v55, %v456_v53  ;;  %v435_v57 = vadd.f32 %v434_v54, %v383_v23 }
 0x10f   : > { %v436_v60 = vadd.f32 %v647_v17, %v435_v57  ;;  %v472_v61 = vadd.f32 %v471_v56, %v457_v58 }
 0x111   : > { %v473_v63 = vadd.f32 %v472_v61, %v458_v59  ;;  %v437_v0 = vadd.f32 %v648_v21, %v436_v60 }
 0x113   : > { %v438_v2 = vadd.f32 %v437_v0, %v396_v36  ;;  %v474_v3 = vadd.f32 %v473_v63, %v459_v62 }
 0x115   : > { %v475_v4 = vadd.f32 %v474_v3, %v460_v1  ;;  %v439_v5 = vadd.f32 %v438_v2, %v399_v43 }
 0x117   : > { %v440_v8 = vadd.f32 %v651_v34, %v439_v5  ;;  %v476_v9 = vadd.f32 %v475_v4, %v461_v6 }
 0x119   : > { %v441_v11 = vadd.f32 %v652_v41, %v440_v8  ;;  %v477_v12 = vadd.f32 %v476_v9, %v462_v7 }
 0x11b   : > { %v442_v13 = vrot.slane %v441_v11, 4  ;;  %v478_v14 = vadd.f32 %v477_v12, %v463_v10 }
 0x11d   : > { %v443_v15 = vadd.f32 %v442_v13, %v441_v11  ;;  %v479_v16 = vrot.slane %v478_v14, 4 }
 0x11f   : > { %v444_v17 = vrot.slane %v443_v15, 2  ;;  %v480_v18 = vadd.f32 %v479_v16, %v478_v14 }
 0x121   : > { %v445_v19 = vadd.f32 %v444_v17, %v443_v15  ;;  %v481_v20 = vrot.slane %v480_v18, 2 }
 0x123   : > { %v446_v21 = vrot.slane %v445_v19, 1  ;;  %v482_v22 = vadd.f32 %v481_v20, %v480_v18 }
 0x125   : > { %v483_v23 = vrot.slane %v482_v22, 1  ;;  %v447_v24 = vadd.f32 %v446_v21, %v445_v19 }
 0x127   : > { %v484_v25 = vadd.f32 %v483_v23, %v482_v22 }
 0x129   : > { %v486_v26 = vsel %vm485_vm0, %v447_v24, %v484_v25 }
 0x12a   : > { %v488_v27 = vsel %vm487_vm1, %v486_v26, 0.0 }
 0x12b   : > { %489 = vst [vmem:[%s184_s17] sm:$0xff] %v488_v27 }
 0x12c PF: > { %s14_s12 = sadd.s32 1, %s699_s12  }
 0x12d   : > { %p11_p5 = scmp.ge.s32.totalorder %s14_s12, 6  }
 0x12f   :  { %13 = sbr.rel (!%p11_p5) target bundleno = 1 (0x1), region = 70 }

// kernel: common_conv_forward.3
= control target key start
LH: loop header
LB: loop body
LE: loop exit
PB: predicated region body
PF: predicated region fallthrough
CT: control target
= control target key end

     0   :  { %s373_s12 = smov 0   ;;  %s468_s0 = inlined_call_operand.vmem [shape: f32[512,128], index: 0, kind: input, shape index: {}]   ;;  %s469_s1 = inlined_call_operand.vmem [shape: f32[1,128], index: 1, kind: input, shape index: {}]   ;;  %s470_s2 = inlined_call_operand.vmem [shape: f32[1,128], index: 2, kind: input, shape index: {}]   ;;  %s471_s3 = inlined_call_operand.vmem [shape: f32[512,128], index: 3, kind: output, shape index: {}]  }
   0x1 LB: > { %s324_s13 = sadd.s32 4294967295, %s351_s12   ;;  %p328_p0 = scmp.ge.s32.totalorder %s351_s12, 1  ;;  %s351_s12 = sphi %s373_s12, %s13_s12  }
   0x2   : > { %p138_p1 = scmp.lt.s32.totalorder %s351_s12, 5 }
   0x4   : > { %p139_p2 = pnand %p328_p0, %p138_p1 }
   0x5   : > { %s329_s14 = sshll.u32 (!%p139_p2), %s324_s13, 4  ;;  %v384_v0 = vld [vmem:[%s469_s1] ss:$0 sm:$0xff] (!%p139_p2) }
   0x6   : > { %142 = sbr.rel (%p139_p2) target bundleno = 34 (0x22), region = 32  ;;  %p163_p3 = scmp.lt.s32.totalorder (!%p139_p2), %s329_s14, 63  ;;  %v394_v1 = vld [vmem:[%s470_s2] ss:$0 sm:$0xff] (!%p139_p2) }
   0xd   : > { %s473_s14 = smov (!%p163_p3, %s329_s14), 63 }
   0xe   : > { %s330_s15 = sshll.u32 %s473_s14, 3 }
   0xf   : > { %s389_s20 = scalar_lea.vmem %s468_s0, %s330_s15  ;;  %s417_s25 = scalar_lea.vmem %s471_s3, %s330_s15 }
  0x10   : > { %v174_v2 = vld [vmem:[%s389_s20] sm:$0xff]  ;;  %v175_v3 = vld [vmem:[%s389_s20 + $0x8] sm:$0xff]  ;;  %v176_v4 = vld [vmem:[%s389_s20 + $0x10] sm:$0xff] }
  0x11   : > { %v197_v5 = vmul.f32 %v384_v0, %v174_v2  ;;  %v198_v6 = vmul.f32 %v384_v0, %v175_v3  ;;  %v199_v7 = vmul.f32 %v384_v0, %v176_v4  ;;  %v177_v8 = vld [vmem:[%s389_s20 + $0x18] sm:$0xff]  ;;  %v178_v9 = vld [vmem:[%s389_s20 + $0x20] sm:$0xff]  ;;  %v179_v10 = vld [vmem:[%s389_s20 + $0x28] sm:$0xff] }
  0x12   : > { %v200_v11 = vmul.f32 %v384_v0, %v177_v8  ;;  %v201_v12 = vmul.f32 %v384_v0, %v178_v9  ;;  %v202_v13 = vmul.f32 %v384_v0, %v179_v10  ;;  %v180_v14 = vld [vmem:[%s389_s20 + $0x30] sm:$0xff]  ;;  %v181_v15 = vld [vmem:[%s389_s20 + $0x38] sm:$0xff]  ;;  %v182_v24 = vld [vmem:[%s389_s20 + $0x40] sm:$0xff] }
  0x13   : > { %v220_v16 = vadd.f32 %v394_v1, %v197_v5  ;;  %v221_v17 = vadd.f32 %v394_v1, %v198_v6  ;;  %v222_v18 = vadd.f32 %v394_v1, %v199_v7  ;;  %v203_v19 = vmul.f32 %v384_v0, %v180_v14  ;;  %v183_v25 = vld [vmem:[%s389_s20 + $0x48] sm:$0xff]  ;;  %v184_v26 = vld [vmem:[%s389_s20 + $0x50] sm:$0xff]  ;;  %v185_v31 = vld [vmem:[%s389_s20 + $0x58] sm:$0xff] }
  0x14   : > { %v223_v20 = vadd.f32 %v394_v1, %v200_v11  ;;  %v224_v21 = vadd.f32 %v394_v1, %v201_v12  ;;  %v225_v22 = vadd.f32 %v394_v1, %v202_v13  ;;  %v204_v23 = vmul.f32 %v384_v0, %v181_v15  ;;  %v186_v32 = vld [vmem:[%s389_s20 + $0x60] sm:$0xff]  ;;  %v187_v33 = vld [vmem:[%s389_s20 + $0x68] sm:$0xff]  ;;  %v188_v38 = vld [vmem:[%s389_s20 + $0x70] sm:$0xff] }
  0x15   : > { %v236_v27 = vmax.f32 %v220_v16, 0.0  ;;  %v237_v28 = vmax.f32 %v221_v17, 0.0  ;;  %v238_v29 = vmax.f32 %v222_v18, 0.0  ;;  %v226_v30 = vadd.f32 %v394_v1, %v203_v19  ;;  %v189_v43 = vld [vmem:[%s389_s20 + $0x78] sm:$0xff] }
  0x16   : > { %v239_v34 = vmax.f32 %v223_v20, 0.0  ;;  %v240_v35 = vmax.f32 %v224_v21, 0.0  ;;  %v241_v36 = vmax.f32 %v225_v22, 0.0  ;;  %v227_v37 = vadd.f32 %v394_v1, %v204_v23 }
  0x17   : > { %252 = vst [vmem:[%s417_s25] sm:$0xff] %v236_v27  ;;  %253 = vst [vmem:[%s417_s25 + $0x8] sm:$0xff] %v237_v28  ;;  %v242_v39 = vmax.f32 %v226_v30, 0.0  ;;  %v205_v40 = vmul.f32 %v384_v0, %v182_v24  ;;  %v206_v41 = vmul.f32 %v384_v0, %v183_v25  ;;  %v207_v42 = vmul.f32 %v384_v0, %v184_v26 }
  0x18   : > { %254 = vst [vmem:[%s417_s25 + $0x10] sm:$0xff] %v238_v29  ;;  %255 = vst [vmem:[%s417_s25 + $0x18] sm:$0xff] %v239_v34  ;;  %v243_v44 = vmax.f32 %v227_v37, 0.0  ;;  %v208_v45 = vmul.f32 %v384_v0, %v185_v31  ;;  %v209_v46 = vmul.f32 %v384_v0, %v186_v32  ;;  %v210_v47 = vmul.f32 %v384_v0, %v187_v33 }
  0x19   : > { %256 = vst [vmem:[%s417_s25 + $0x20] sm:$0xff] %v240_v35  ;;  %257 = vst [vmem:[%s417_s25 + $0x28] sm:$0xff] %v241_v36  ;;  %v228_v48 = vadd.f32 %v394_v1, %v205_v40  ;;  %v229_v49 = vadd.f32 %v394_v1, %v206_v41  ;;  %v230_v50 = vadd.f32 %v394_v1, %v207_v42 }
  0x1a   : > { %258 = vst [vmem:[%s417_s25 + $0x30] sm:$0xff] %v242_v39  ;;  %v211_v51 = vmul.f32 %v384_v0, %v188_v38  ;;  %259 = vst [vmem:[%s417_s25 + $0x38] sm:$0xff] %v243_v44  ;;  %v231_v52 = vadd.f32 %v394_v1, %v208_v45  ;;  %v232_v53 = vadd.f32 %v394_v1, %v209_v46 }
  0x1b   : > { %v233_v54 = vadd.f32 %v394_v1, %v210_v47  ;;  %v212_v55 = vmul.f32 %v384_v0, %v189_v43  ;;  %v244_v56 = vmax.f32 %v228_v48, 0.0  ;;  %v245_v57 = vmax.f32 %v229_v49, 0.0 }
  0x1c   : > { %v246_v58 = vmax.f32 %v230_v50, 0.0  ;;  %v234_v59 = vadd.f32 %v394_v1, %v211_v51  ;;  %v247_v60 = vmax.f32 %v231_v52, 0.0  ;;  %v248_v61 = vmax.f32 %v232_v53, 0.0 }
  0x1d   : > { %v249_v62 = vmax.f32 %v233_v54, 0.0  ;;  %v235_v63 = vadd.f32 %v394_v1, %v212_v55  ;;  %260 = vst [vmem:[%s417_s25 + $0x40] sm:$0xff] %v244_v56  ;;  %261 = vst [vmem:[%s417_s25 + $0x48] sm:$0xff] %v245_v57 }
  0x1e   : > { %262 = vst [vmem:[%s417_s25 + $0x50] sm:$0xff] %v246_v58  ;;  %v250_v2 = vmax.f32 %v234_v59, 0.0  ;;  %263 = vst [vmem:[%s417_s25 + $0x58] sm:$0xff] %v247_v60 }
  0x1f   : > { %264 = vst [vmem:[%s417_s25 + $0x60] sm:$0xff] %v248_v61  ;;  %265 = vst [vmem:[%s417_s25 + $0x68] sm:$0xff] %v249_v62  ;;  %v251_v0 = vmax.f32 %v235_v63, 0.0 }
  0x20   : > { %266 = vst [vmem:[%s417_s25 + $0x70] sm:$0xff] %v250_v2 }
  0x21   : > { %267 = vst [vmem:[%s417_s25 + $0x78] sm:$0xff] %v251_v0 }
  0x22 PF: > { %s13_s12 = sadd.s32 1, %s351_s12  }
  0x23   : > { %p10_p4 = scmp.ge.s32.totalorder %s13_s12, 6  }
  0x25   :  { %12 = sbr.rel (!%p10_p4) target bundleno = 1 (0x1), region = 62 }

</bundles_post_ra>
